<compile_context>
chip_gen: v6e
topology: v6e:2x2x1
jax: 0.10.0
libtpu: 0.0.40
codegen_flags: <defaults>
</compile_context>

<pallas_src>
import functools

import jax
import jax.numpy as jnp
import numpy as np
from jax import lax
from jax.experimental import pallas as pl
from jax.experimental.pallas import tpu as pltpu

TASKS = ('d', 'x', 'y', 'h', 'w', 'l', 'ori', 'aux')
LAMBDAS = (1.0, 1.0, 1.0, 1.0, 1.0, 1.0, 1.0, 1.0)
NT = len(TASKS)

_N_OUT = 10        # output columns
_N_LAB = 11        # label columns
_N_SUMS = 12       # 10 L1 column-sums + Laplacian-loss sum + BCE sum
_OUT_LANES = 128   # lane-dense per-tile output slab
_DEFAULT_TB = 2048 # batch-tile rows (sublane axis); ~1 MiB/tile/input in VMEM


def _round_up(x, m):
    return ((x + m - 1) // m) * m


def _multitask_sums_kernel(pred_ref, lab_ref, sums_ref, *, batch, tb):
    """pred_ref: (TB, 10), lab_ref: (TB, 11), batch-major (batch on sublanes).

    Writes a (1, 128) lane-dense slab of per-tile SUMS:
      lanes 0..9 : sum_b |pred_col - lab_col|  (L1 tasks + |mu - d| for val 'd')
      lane 10    : sum_b Laplacian loss for 'd'
      lane 11    : sum_b BCE-with-logits for 'aux'
      lanes 12.. : zeros
    """
    i = pl.program_id(0)
    pred = pred_ref[...].astype(jnp.float32)          # (TB, 10)
    lab = lab_ref[...].astype(jnp.float32)            # (TB, 11)

    # Valid-row mask for the (possibly padded) final tile.
    row = lax.broadcasted_iota(jnp.int32, (tb, 1), 0)
    valid = (i * tb + row) < batch                    # (TB, 1) bool

    # Align label columns 1:1 with output columns: [0,1,3,3,4,5,6,7,8,10]
    # (static lane slices + one concat; cols 3 and 9 pair with si / aux_logit
    # as dummies, their L1 sums are simply never read afterwards).
    lab_al = jnp.concatenate(
        [lab[:, 0:2], lab[:, 3:4], lab[:, 3:4], lab[:, 4:9], lab[:, 10:11]],
        axis=1)                                       # (TB, 10)

    # Shared L1 part of every task: one full-tile VPU pass + sublane reduce.
    diff = jnp.where(valid, jnp.abs(pred - lab_al), 0.0)
    l1_sums = jnp.sum(diff, axis=0, keepdims=True)    # (1, 10)

    # 'd' (train): Laplacian loss |1 - mu/gt| * exp(-si) + si  (exp -> EUP).
    mu = pred[:, 2:3]
    si = pred[:, 3:4]
    gt_d = jnp.where(valid, lab[:, 3:4], 1.0)         # guard pad-row division
    lap = jnp.abs(1.0 - mu / gt_d) * jnp.exp(-si) + si
    lap_sum = jnp.sum(jnp.where(valid, lap, 0.0), axis=0, keepdims=True)

    # 'aux': numerically stable BCE with logits (log1p/exp -> EUP).
    z = pred[:, 9:10]
    yv = lab[:, 10:11]
    bce = jnp.maximum(z, 0.0) - z * yv + jnp.log1p(jnp.exp(-jnp.abs(z)))
    bce_sum = jnp.sum(jnp.where(valid, bce, 0.0), axis=0, keepdims=True)

    # Single lane-dense store: 12 sums in lanes 0..11, zeros elsewhere.
    sums_ref[...] = jnp.concatenate(
        [l1_sums, lap_sum, bce_sum,
         jnp.zeros((1, _OUT_LANES - _N_SUMS), jnp.float32)], axis=1)


def _call_sums_kernel(outputs, labels, tb):
    batch = outputs.shape[0]
    assert labels.shape[0] == batch
    assert outputs.shape[1] == _N_OUT and labels.shape[1] == _N_LAB
    num_tiles = pl.cdiv(batch, tb)
    kernel = functools.partial(_multitask_sums_kernel, batch=batch, tb=tb)
    return pl.pallas_call(
        kernel,
        out_shape=jax.ShapeDtypeStruct((num_tiles, 1, _OUT_LANES), jnp.float32),
        grid=(num_tiles,),
        in_specs=[pl.BlockSpec((tb, _N_OUT), lambda i: (i, 0)),
                  pl.BlockSpec((tb, _N_LAB), lambda i: (i, 0))],
        out_specs=pl.BlockSpec((None, 1, _OUT_LANES), lambda i: (i, 0, 0)),
        compiler_params=pltpu.CompilerParams(
            dimension_semantics=("parallel",)),
    )(outputs, labels)


@functools.partial(jax.jit, static_argnames=('tb',))
def _multitask_loss_impl(outputs, labels, lam, tb):
    B = outputs.shape[0]
    partials = _call_sums_kernel(outputs, labels, tb)          # (T, 1, 128)
    m = jnp.sum(partials, axis=0)[0, :_N_SUMS] * (1.0 / B)     # batch means (12,)

    # task order: ('d', 'x', 'y', 'h', 'w', 'l', 'ori', 'aux')
    ori = 0.5 * (m[7] + m[8])       # torch L1 over (B,2) == mean of the 2 col-means
    tr_vals = jnp.stack([m[10], m[0], m[1], m[4], m[5], m[6], ori, m[11]])
    val_vals = jnp.stack([m[2], m[0], m[1], m[4], m[5], m[6], ori, m[11]])

    weighted = lam * tr_vals
    loss = jnp.sum(weighted)
    return loss, weighted, val_vals


def multitask_loss(outputs, labels, lambdas=LAMBDAS, phase='train', tb=None):
    """Mirrors MultiTaskLoss.forward: returns (loss, loss_values[NT])."""
    assert phase in ('train', 'val')
    B = outputs.shape[0]
    if tb is None:
        tb = min(_DEFAULT_TB, _round_up(max(B, 1), 8))
    lam = jnp.asarray(lambdas, dtype=jnp.float32)
    loss, weighted_tr, val_vals = _multitask_loss_impl(outputs, labels, lam, tb)
    if phase == 'val':
        return loss, val_vals            # unweighted validation losses
    return loss, weighted_tr             # lambda-weighted training losses


def _reference(outputs, labels, lambdas):
    """Pure NumPy reference (same math as the torch module)."""
    o = np.asarray(outputs, dtype=np.float32)
    g = np.asarray(labels, dtype=np.float32)
    mu, si, gt_d = o[:, 2:3], o[:, 3:4], g[:, 3:4]
    d_tr = np.mean(np.abs(1.0 - mu / gt_d) * np.exp(-si) + si)
    l1 = lambda a, b: np.mean(np.abs(a - b))
    x = l1(o[:, 0:1], g[:, 0:1]); y = l1(o[:, 1:2], g[:, 1:2])
    h = l1(o[:, 4:5], g[:, 4:5]); w = l1(o[:, 5:6], g[:, 5:6])
    l = l1(o[:, 6:7], g[:, 6:7]); ori = l1(o[:, 7:9], g[:, 7:9])
    z, yv = o[:, 9:10], g[:, 10:11]
    aux = np.mean(np.maximum(z, 0.0) - z * yv + np.log1p(np.exp(-np.abs(z))))
    vals = np.array([d_tr, x, y, h, w, l, ori, aux], dtype=np.float32)
    weighted = np.asarray(lambdas, dtype=np.float32) * vals
    val_vals = np.array([l1(mu, gt_d), x, y, h, w, l, ori, aux], dtype=np.float32)
    return weighted.sum(), weighted, val_vals


def _make_inputs(batch, seed):
    key = jax.random.PRNGKey(seed)
    k1, k2 = jax.random.split(key)
    outputs = jax.random.normal(k1, (batch, _N_OUT), dtype=jnp.float32)
    labels = jax.random.normal(k2, (batch, _N_LAB), dtype=jnp.float32)
    # ground-truth distance must be strictly positive (it divides mu)
    labels = labels.at[:, 3].set(jnp.abs(labels[:, 3]) + 1.0)
    # aux label is a binary flag
    labels = labels.at[:, 10].set((labels[:, 10] > 0).astype(jnp.float32))
    return outputs, labels


if __name__ == "__main__":
    # Case 1: small batch, single (partially padded) tile.
    B = 10
    outputs, labels = _make_inputs(B, 0)

    loss, loss_values = multitask_loss(outputs, labels, LAMBDAS, phase='train')
    loss = jax.block_until_ready(loss)
    loss_values = jax.block_until_ready(loss_values)

    ref_loss, ref_weighted, ref_val = _reference(np.asarray(outputs),
                                                 np.asarray(labels), LAMBDAS)
    np.testing.assert_allclose(np.asarray(loss), ref_loss, rtol=1e-5, atol=1e-5)
    np.testing.assert_allclose(np.asarray(loss_values), ref_weighted,
                               rtol=1e-5, atol=1e-5)

    loss_v, val_values = multitask_loss(outputs, labels, LAMBDAS, phase='val')
    jax.block_until_ready(loss_v)
    np.testing.assert_allclose(np.asarray(val_values), ref_val, rtol=1e-5, atol=1e-5)

    # Case 2: force a small batch tile -> multiple grid steps + masked last tile.
    B2 = 37
    outputs2, labels2 = _make_inputs(B2, 1)
    loss2, vals2 = multitask_loss(outputs2, labels2, LAMBDAS, phase='train', tb=16)
    jax.block_until_ready(loss2)
    ref_loss2, ref_weighted2, _ = _reference(np.asarray(outputs2),
                                             np.asarray(labels2), LAMBDAS)
    np.testing.assert_allclose(np.asarray(loss2), ref_loss2, rtol=1e-5, atol=1e-5)
    np.testing.assert_allclose(np.asarray(vals2), ref_weighted2,
                               rtol=1e-5, atol=1e-5)

    print("KERNEL_OK")
</pallas_src>

<mosaic_0001>
module attributes {stable_mosaic.version = 11 : i64} {
  func.func @_multitask_sums_kernel(%arg0: i32, %arg1: memref<16x10xf32, #tpu.memory_space<vmem>>, %arg2: memref<16x11xf32, #tpu.memory_space<vmem>>, %arg3: memref<1x1x128xf32, #tpu.memory_space<vmem>>) attributes {dimension_semantics = [#tpu.dimension_semantics<parallel>], iteration_bounds = array<i64: 1>, scalar_prefetch = 0 : i64, scratch_operands = 0 : i64, tpu.core_type = #tpu.core_type<tc>, window_params = [{transform_indices = @transform_0, window_bounds = array<i64: 16, 10>}, {transform_indices = @transform_1, window_bounds = array<i64: 16, 11>}, {transform_indices = @transform_2, window_bounds = array<i64: 1, 1, 128>}]} {
    %c0 = arith.constant 0 : index
    %c0_0 = arith.constant 0 : index
    %0 = vector.load %arg1[%c0, %c0_0] : memref<16x10xf32, #tpu.memory_space<vmem>>, vector<16x10xf32>
    %c0_1 = arith.constant 0 : index
    %c0_2 = arith.constant 0 : index
    %1 = vector.load %arg2[%c0_1, %c0_2] : memref<16x11xf32, #tpu.memory_space<vmem>>, vector<16x11xf32>
    %2 = tpu.iota {dimensions = array<i32: 0>} : vector<16x1xi32>
    %c16_i32 = arith.constant 16 : i32
    %3 = arith.muli %arg0, %c16_i32 : i32
    %4 = vector.broadcast %3 : i32 to vector<16x1xi32>
    %5 = arith.addi %4, %2 : vector<16x1xi32>
    %c10_i32 = arith.constant 10 : i32
    %6 = vector.broadcast %c10_i32 : i32 to vector<16x1xi32>
    %7 = arith.cmpi slt, %5, %6 : vector<16x1xi32>
    %8 = vector.extract_strided_slice %1 {offsets = [0, 0], sizes = [16, 2], strides = [1, 1]} : vector<16x11xf32> to vector<16x2xf32>
    %9 = vector.extract_strided_slice %1 {offsets = [0, 3], sizes = [16, 1], strides = [1, 1]} : vector<16x11xf32> to vector<16x1xf32>
    %10 = vector.extract_strided_slice %1 {offsets = [0, 3], sizes = [16, 1], strides = [1, 1]} : vector<16x11xf32> to vector<16x1xf32>
    %11 = vector.extract_strided_slice %1 {offsets = [0, 4], sizes = [16, 5], strides = [1, 1]} : vector<16x11xf32> to vector<16x5xf32>
    %12 = vector.extract_strided_slice %1 {offsets = [0, 10], sizes = [16, 1], strides = [1, 1]} : vector<16x11xf32> to vector<16x1xf32>
    %13 = tpu.concatenate %8, %9, %10, %11, %12 in 1 : vector<16x2xf32>, vector<16x1xf32>, vector<16x1xf32>, vector<16x5xf32>, vector<16x1xf32> -> vector<16x10xf32>
    %14 = arith.subf %0, %13 : vector<16x10xf32>
    %15 = math.absf %14 : vector<16x10xf32>
    %cst = arith.constant 0.000000e+00 : f32
    %16 = vector.shape_cast %7 : vector<16x1xi1> to vector<16x1xi1>
    %17 = vector.broadcast %16 : vector<16x1xi1> to vector<16x10xi1>
    %18 = vector.broadcast %cst : f32 to vector<16x10xf32>
    %19 = arith.select %17, %15, %18 : vector<16x10xi1>, vector<16x10xf32>
    %cst_3 = arith.constant dense<0.000000e+00> : vector<10xf32>
    %20 = vector.multi_reduction <add>, %19, %cst_3 [0] : vector<16x10xf32> to vector<10xf32>
    %21 = vector.shape_cast %20 : vector<10xf32> to vector<1x10xf32>
    %22 = vector.extract_strided_slice %0 {offsets = [0, 2], sizes = [16, 1], strides = [1, 1]} : vector<16x10xf32> to vector<16x1xf32>
    %23 = vector.extract_strided_slice %0 {offsets = [0, 3], sizes = [16, 1], strides = [1, 1]} : vector<16x10xf32> to vector<16x1xf32>
    %24 = vector.extract_strided_slice %1 {offsets = [0, 3], sizes = [16, 1], strides = [1, 1]} : vector<16x11xf32> to vector<16x1xf32>
    %cst_4 = arith.constant 1.000000e+00 : f32
    %25 = vector.broadcast %cst_4 : f32 to vector<16x1xf32>
    %26 = arith.select %7, %24, %25 : vector<16x1xi1>, vector<16x1xf32>
    %27 = arith.divf %22, %26 : vector<16x1xf32>
    %cst_5 = arith.constant 1.000000e+00 : f32
    %28 = vector.broadcast %cst_5 : f32 to vector<16x1xf32>
    %29 = arith.subf %28, %27 : vector<16x1xf32>
    %30 = math.absf %29 : vector<16x1xf32>
    %cst_6 = arith.constant 0.000000e+00 : f32
    %31 = vector.broadcast %cst_6 : f32 to vector<16x1xf32>
    %32 = arith.subf %31, %23 : vector<16x1xf32>
    %33 = math.exp %32 : vector<16x1xf32>
    %34 = arith.mulf %30, %33 : vector<16x1xf32>
    %35 = arith.addf %34, %23 : vector<16x1xf32>
    %cst_7 = arith.constant 0.000000e+00 : f32
    %36 = vector.broadcast %cst_7 : f32 to vector<16x1xf32>
    %37 = arith.select %7, %35, %36 : vector<16x1xi1>, vector<16x1xf32>
    %cst_8 = arith.constant dense<0.000000e+00> : vector<1xf32>
    %38 = vector.multi_reduction <add>, %37, %cst_8 [0] : vector<16x1xf32> to vector<1xf32>
    %39 = vector.shape_cast %38 : vector<1xf32> to vector<1x1xf32>
    %40 = vector.extract_strided_slice %0 {offsets = [0, 9], sizes = [16, 1], strides = [1, 1]} : vector<16x10xf32> to vector<16x1xf32>
    %41 = vector.extract_strided_slice %1 {offsets = [0, 10], sizes = [16, 1], strides = [1, 1]} : vector<16x11xf32> to vector<16x1xf32>
    %cst_9 = arith.constant 0.000000e+00 : f32
    %42 = vector.broadcast %cst_9 : f32 to vector<16x1xf32>
    %43 = arith.maximumf %40, %42 : vector<16x1xf32>
    %44 = arith.mulf %40, %41 : vector<16x1xf32>
    %45 = arith.subf %43, %44 : vector<16x1xf32>
    %46 = math.absf %40 : vector<16x1xf32>
    %cst_10 = arith.constant 0.000000e+00 : f32
    %47 = vector.broadcast %cst_10 : f32 to vector<16x1xf32>
    %48 = arith.subf %47, %46 : vector<16x1xf32>
    %49 = math.exp %48 : vector<16x1xf32>
    %50 = math.log1p %49 : vector<16x1xf32>
    %51 = arith.addf %45, %50 : vector<16x1xf32>
    %cst_11 = arith.constant 0.000000e+00 : f32
    %52 = vector.broadcast %cst_11 : f32 to vector<16x1xf32>
    %53 = arith.select %7, %51, %52 : vector<16x1xi1>, vector<16x1xf32>
    %cst_12 = arith.constant dense<0.000000e+00> : vector<1xf32>
    %54 = vector.multi_reduction <add>, %53, %cst_12 [0] : vector<16x1xf32> to vector<1xf32>
    %55 = vector.shape_cast %54 : vector<1xf32> to vector<1x1xf32>
    %cst_13 = arith.constant 0.000000e+00 : f32
    %56 = vector.broadcast %cst_13 : f32 to vector<1x116xf32>
    %57 = tpu.concatenate %21, %39, %55, %56 in 1 : vector<1x10xf32>, vector<1x1xf32>, vector<1x1xf32>, vector<1x116xf32> -> vector<1x128xf32>
    %c0_14 = arith.constant 0 : index
    %c0_15 = arith.constant 0 : index
    %c0_16 = arith.constant 0 : index
    %58 = vector.load %arg3[%c0_14, %c0_15, %c0_16] : memref<1x1x128xf32, #tpu.memory_space<vmem>>, vector<1x1x128xf32>
    %59 = vector.shape_cast %58 : vector<1x1x128xf32> to vector<1x128xf32>
    %60 = vector.shape_cast %57 : vector<1x128xf32> to vector<1x1x128xf32>
    tpu.vector_store %arg3[%c0_14, %c0_15, %c0_16], %60 {strides = array<i32>} : memref<1x1x128xf32, #tpu.memory_space<vmem>>, vector<1x1x128xf32>,
    return
  }
  func.func @transform_0(%arg0: i32) -> (i32, i32) {
    %c0_i32 = arith.constant 0 : i32
    %c0_i32_0 = arith.constant 0 : i32
    return %arg0, %c0_i32 : i32, i32
  }
  func.func @transform_1(%arg0: i32) -> (i32, i32) {
    %c0_i32 = arith.constant 0 : i32
    %c0_i32_0 = arith.constant 0 : i32
    return %arg0, %c0_i32 : i32, i32
  }
  func.func @transform_2(%arg0: i32) -> (i32, i32, i32) {
    %c0_i32 = arith.constant 0 : i32
    %c0_i32_0 = arith.constant 0 : i32
    %c0_i32_1 = arith.constant 0 : i32
    return %arg0, %c0_i32, %c0_i32_0 : i32, i32, i32
  }
}

</mosaic_0001>

<bundles_post_ra>
// kernel: _multitask_loss_impl.1
= control target key start
LH: loop header
LB: loop body
LE: loop exit
PB: predicated region body
PF: predicated region fallthrough
CT: control target
= control target key end

     0   :  { %7 = vsyncpa [#allocation3], 0  ;;  %s372_s0 = inlined_call_operand.hbm [shape: f32[10,10], index: 0, kind: input, shape index: {}]   ;;  %s373_s1 = inlined_call_operand.hbm [shape: f32[10,11], index: 1, kind: input, shape index: {}]   ;;  %s374_s2 = inlined_call_operand.vmem [shape: f32[1,1,128], index: 2, kind: output, shape index: {}]  }
   0x1   :  { %8 = vsyncpa [#allocation5], 0  ;;  %s280_s9 = smov [#allocation2]  }
   0x2   :  { %s14_s10 = sshll.u32 %s280_s9, 4  ;;  %s15_s10 = int_to_ptr.vmem [resolvable:$true] %s14_s10 }
   0x3   :  { %s244_s11 = scalar_lea.vmem %s15_s10, 256  ;;  %p249_p1 = scmp.lt.s32.totalorder %s15_s10, %s15_s10 }
   0x4   :  { %p245_p0 = scmp.ne.s32.totalorder %s15_s10, %s244_s11  ;;  %p250_p2 = scmp.lt.s32.totalorder %s244_s11, %s244_s11 }
   0x6   :  { %p251_p3 = por %p250_p2, %p249_p1 }
   0x8   :  { %p252_p4 = pnand %p251_p3, %p245_p0 }
   0xa   :  { %255 = shalt.err (!%p252_p4)
}
   0xb   :  { %s281_s12 = smov 128   ;;  %s282_s13 = smov 8  }
   0xc   :  { %20 = dma.hbm_to_vmem [thread:$0]  %s372_s0, 256, %s15_s10, [#allocation3], %s281_s12, %s281_s12, %s282_s13  }
   0xd   :  { %s283_s16 = smov [#allocation4]  }
   0xe   :  { %s26_s17 = sshll.u32 %s283_s16, 4  ;;  %s27_s17 = int_to_ptr.vmem [resolvable:$true] %s26_s17 }
   0xf   :  { %s264_s18 = scalar_lea.vmem %s27_s17, 256  ;;  %p269_p6 = scmp.lt.s32.totalorder %s27_s17, %s27_s17 }
  0x10   :  { %p265_p5 = scmp.ne.s32.totalorder %s27_s17, %s264_s18  ;;  %p270_p7 = scmp.lt.s32.totalorder %s264_s18, %s264_s18 }
  0x12   :  { %p271_p8 = por %p270_p7, %p269_p6 }
  0x14   :  { %p272_p9 = pnand %p271_p8, %p265_p5 }
  0x16   :  { %275 = shalt.err (!%p272_p9)
}
  0x17   :  { %32 = dma.hbm_to_vmem [thread:$0]  %s373_s1, 256, %s27_s17, [#allocation5], %s281_s12, %s281_s12, %s282_s13  }
  0x18   :  { %276 = dma.done.wait [#allocation3], 256  }
  0x19   :  { %277 = vsyncadd [#allocation3], 4294967040 }
  0x1a   :  { %278 = dma.done.wait [#allocation5], 256  }
  0x1b   :  { %279 = vsyncadd [#allocation5], 4294967040  ;;  %v43_v0 = vlaneseq  ;;  %v312_v3 = vld [vmem:[#allocation2] sm:$0xff]  ;;  %v314_v4 = vld [vmem:[#allocation2 + $0x8] sm:$0xff]  ;;  %s284_s0 = smov 127   ;;  %vm60_vm1 = vcmask 15360  }
  0x1c   :  { %v42_v5 = vld [vmem:[#allocation4 + $0x8] sm:$0xff]  ;;  %v111_v7 = vsub.f32 0.0, %v314_v4  ;;  %v110_v8 = vsub.f32 0.0, %v312_v3  ;;  %v320_v9 = vld [vmem:[#allocation4] sm:$0xff]  ;;  %v155_v14 = vand.u32 2147483647, %v314_v4 }
  0x1d   :  { %v44_v1 = vshrl.u32 %v43_v0, 7  ;;  %56 = vrot.lane.b32.xlu1 %v42_v5, %s284_s0  ;;  %v154_v15 = vand.u32 2147483647, %v312_v3  ;;  %vm63_vm2 = vcmask 23552   ;;  %v149_v33 = vmax.f32 %v314_v4, 0.0  ;;  %s285_s1 = smov 2  }
  0x1e   :  { %v114_v10 = vmul.f32 1.442695, %v111_v7  ;;  %v112_v11 = vmul.f32 1.442695, %v110_v8  ;;  %v157_v16 = vsub.f32 0.0, %v155_v14  ;;  %vm66_vm4 = vcmask 31744  }
  0x1f   :  { %v309_v2 = vadd.s32 8, %v44_v1  ;;  %v156_v17 = vsub.f32 0.0, %v154_v15  ;;  %vm69_vm5 = vcmask 72704   ;;  %v148_v46 = vmax.f32 %v312_v3, 0.0 }
  0x20   :  { %220 = vpow2.f32 %v114_v10  ;;  %v160_v18 = vmul.f32 1.442695, %v157_v16  ;;  %vm184_vm7 = vcmask 80968   ;;  %vm82_vm8 = vcmask 80896  }
  0x21   :  { %vm51_vm0 = vcmp.lt.s32.totalorder %v309_v2, 10  ;;  %54 = vrot.lane.b32.xlu1 %v320_v9, %s284_s0  ;;  %222 = vpow2.f32 %v112_v11  ;;  %v158_v19 = vmul.f32 1.442695, %v156_v17  ;;  %vm138_vm9 = vcmask 23568  }
  0x22   :  { %v93_v6 = vsel %vm51_vm0, %v42_v5, 1.0  ;;  %224 = vpow2.f32 %v160_v18  ;;  %vm203_vm10 = vcmask 89088   ;;  %vm205_vm11 = vcmask 97280  }
  0x23   :  { %98 = vrot.lane.b32.xlu0 %v93_v6, %s284_s0  ;;  %226 = vpow2.f32 %v158_v19 }
  0x27   :  { %96 = vrot.lane.b32.xlu0 %v320_v9, %s284_s0 }
  0x2d   :  { %v221_v12 = vpop.eup %220 }
  0x2e   :  { %120 = vrot.lane.b32.xlu0 %v221_v12, %s284_s0  ;;  %v223_v13 = vpop.eup %222 }
  0x2f   :  { %118 = vrot.lane.b32.xlu1 %v223_v13, %s284_s0  ;;  %v225_v20 = vpop.eup %224 }
  0x30   :  { %v171_v21 = vadd.f32 1.0, %v225_v20  ;;  %v227_v22 = vpop.eup %226  ;;  %v174_v24 = vmul.f32 -0.5, %v225_v20  ;;  %v177_v28 = vand.u32 2147483647, %v225_v20 }
  0x31   :  { %v162_v23 = vadd.f32 1.0, %v227_v22  ;;  %v165_v25 = vmul.f32 -0.5, %v227_v22  ;;  %v168_v35 = vand.u32 2147483647, %v227_v22 }
  0x32   :  { %130 = vrot.lane.b32.xlu0 %v314_v4, %s284_s0  ;;  %228 = vlog2.f32 %v171_v21  ;;  %v175_v26 = vadd.f32 1.0, %v174_v24  ;;  %vm329_vm3 = vcmp.lt.f32.partialorder %v177_v28, 0.0004427343 }
  0x33   :  { %128 = vrot.lane.b32.xlu1 %v312_v3, %s284_s0  ;;  %230 = vlog2.f32 %v162_v23  ;;  %v166_v29 = vadd.f32 1.0, %v165_v25  ;;  %vm340_vm6 = vcmp.lt.f32.partialorder %v168_v35, 0.0004427343 }
  0x34   :  { %v176_v31 = vmul.f32 %v225_v20, %v175_v26 }
  0x35   :  { %v167_v40 = vmul.f32 %v227_v22, %v166_v29 }
  0x3f   :  { %v229_v27 = vpop.eup %228 }
  0x40   :  { %v173_v30 = vmul.f32 0.6931472, %v229_v27  ;;  %v231_v32 = vpop.eup %230 }
  0x41   :  { %v164_v43 = vmul.f32 0.6931472, %v231_v32 }
  0x42   :  { %v179_v42 = vsel %vm329_vm3, %v176_v31, %v173_v30 }
  0x43   :  { %v170_v56 = vsel %vm340_vm6, %v167_v40, %v164_v43 }
  0x8f   :  { %v57_v36 = vpop.permute.xlu1 %56 }
  0x90   :  { %v62_v38 = vsel %vm60_vm1, %v42_v5, %v57_v36  ;;  %v151_v39 = vmul.f32 %v57_v36, %v314_v4 }
  0x91   :  { %v65_v41 = vsel %vm63_vm2, %v62_v38, %v42_v5 }
  0x92   :  { %v68_v44 = vsel %vm66_vm4, %v65_v41, %v42_v5  ;;  %v153_v45 = vsub.f32 %v149_v33, %v151_v39 }
  0x93   :  { %v71_v48 = vsel %vm69_vm5, %v68_v44, %v57_v36  ;;  %v55_v49 = vpop.permute.xlu1 %54 }
  0x94   :  { %v73_v50 = vsub.f32 %v314_v4, %v71_v48  ;;  %v181_v51 = vadd.f32 %v179_v42, %v153_v45  ;;  %v61_v53 = vsel %vm60_vm1, %v320_v9, %v55_v49  ;;  %v150_v54 = vmul.f32 %v55_v49, %v312_v3 }
  0x95   :  { %v99_v37 = vpop.permute.xlu0 %98  ;;  %v64_v55 = vsel %vm63_vm2, %v61_v53, %v320_v9 }
  0x96   :  { %232 = vrcp.f32 %v99_v37  ;;  %v75_v57 = vand.u32 2147483647, %v73_v50  ;;  %v183_v58 = vsel %vm51_vm0, %v181_v51, 0.0  ;;  %v67_v59 = vsel %vm66_vm4, %v64_v55, %v320_v9 }
  0x97   :  { %v152_v60 = vsub.f32 %v148_v46, %v150_v54  ;;  %v70_v61 = vsel %vm69_vm5, %v67_v59, %v55_v49  ;;  %v186_v63 = vsel %vm184_vm7, %v183_v58, 0.0 }
  0x98   :  { %v81_v62 = vsel %vm51_vm0, %v75_v57, 0.0  ;;  %v72_v0 = vsub.f32 %v312_v3, %v70_v61 }
  0x99   :  { %v97_v52 = vpop.permute.xlu0 %96  ;;  %v180_v1 = vadd.f32 %v170_v56, %v152_v60  ;;  %v84_v7 = vsel %vm82_vm8, %v81_v62, 0.0 }
  0x9a   :  { %234 = vrcp.f32 %v97_v52  ;;  %v74_v5 = vand.u32 2147483647, %v72_v0 }
  0x9b   :  { %v185_v6 = vsel %vm184_vm7, %v180_v1, 0.0 }
  0x9c   :  { %v187_v8 = vadd.f32 %v186_v63, %v185_v6  ;;  %v83_v10 = vsel %vm82_vm8, %v74_v5, 0.0 }
  0x9d   :  { %v85_v9 = vadd.f32 %v84_v7, %v83_v10 }
  0x9e   :  { %v188_v11 = vrot.slane %v187_v8, 4 }
  0x9f   :  { %v86_v41 = vrot.slane %v85_v9, 4 }
  0xa0   :  { %v189_v14 = vadd.f32 %v188_v11, %v187_v8  ;;  %v121_v18 = vpop.permute.xlu0 %120 }
  0xa1   :  { %v119_v23 = vpop.permute.xlu1 %118  ;;  %v87_v42 = vadd.f32 %v86_v41, %v85_v9 }
  0xa2   :  { %v190_v16 = vrot.slane %v189_v14, 2 }
  0xa3   :  { %v233_v12 = vpop.eup %232  ;;  %v88_v43 = vrot.slane %v87_v42, 2 }
  0xa4   :  { %v105_v13 = vmul.f32 %v233_v12, %v314_v4  ;;  %v191_v21 = vadd.f32 %v190_v16, %v189_v14  ;;  %v131_v26 = vpop.permute.xlu0 %130 }
  0xa5   :  { %v129_v31 = vpop.permute.xlu1 %128  ;;  %v89_v44 = vadd.f32 %v88_v43, %v87_v42 }
  0xa6   :  { %v107_v15 = vsub.f32 1.0, %v105_v13  ;;  %v192_v25 = vrot.slane %v191_v21, 1 }
  0xa7   :  { %v235_v17 = vpop.eup %234  ;;  %v90_v45 = vrot.slane %v89_v44, 1 }
  0xa8   :  { %v109_v19 = vand.u32 2147483647, %v107_v15  ;;  %v103_v20 = vmul.f32 %v235_v17, %v312_v3  ;;  %v193_v29 = vadd.f32 %v192_v25, %v191_v21 }
  0xa9   :  { %v91_v2 = vadd.f32 %v90_v45, %v89_v44 }
  0xaa   :  { %v125_v22 = vmul.f32 %v121_v18, %v109_v19  ;;  %v106_v24 = vsub.f32 1.0, %v103_v20  ;;  %199 = vrot.lane.b32.xlu1 %v193_v29, %s285_s1 }
  0xac   :  { %v135_v27 = vadd.f32 %v131_v26, %v125_v22  ;;  %v108_v28 = vand.u32 2147483647, %v106_v24 }
  0xae   :  { %v124_v30 = vmul.f32 %v119_v23, %v108_v28  ;;  %v137_v4 = vsel %vm51_vm0, %v135_v27, 0.0 }
  0xaf   :  { %v140_v33 = vsel %vm138_vm9, %v137_v4, 0.0 }
  0xb0   :  { %v134_v32 = vadd.f32 %v129_v31, %v124_v30 }
  0xb2   :  { %v139_v3 = vsel %vm138_vm9, %v134_v32, 0.0 }
  0xb3   :  { %v141_v34 = vadd.f32 %v140_v33, %v139_v3 }
  0xb5   :  { %v142_v35 = vrot.slane %v141_v34, 4 }
  0xb7   :  { %v143_v36 = vadd.f32 %v142_v35, %v141_v34 }
  0xb9   :  { %v144_v37 = vrot.slane %v143_v36, 2 }
  0xbb   :  { %v145_v38 = vadd.f32 %v144_v37, %v143_v36 }
  0xbd   :  { %v146_v39 = vrot.slane %v145_v38, 1 }
  0xbf   :  { %v147_v40 = vadd.f32 %v146_v39, %v145_v38 }
  0xc1   :  { %195 = vrot.lane.b32.xlu0 %v147_v40, %s282_s13 }
 0x11c   :  { %v200_v47 = vpop.permute.xlu1 %199 }
 0x133   :  { %v196_v46 = vpop.permute.xlu0 %195 }
 0x134   :  { %v202_v48 = vsel %vm82_vm8, %v91_v2, %v196_v46 }
 0x135   :  { %v204_v49 = vsel %vm203_vm10, %v202_v48, %v200_v47 }
 0x136   :  { %v206_v50 = vsel %vm205_vm11, %v204_v49, 0.0 }
 0x137   :  { %207 = vst [vmem:[%s374_s2] sm:$0x1] %v206_v50 }
 0x138   :  { %212 = vsyncpa [#allocation3], 1 }
 0x139   :  { %213 = vsyncpa [#allocation5], 1 }

</bundles_post_ra>
